<compile_context>
chip_gen: v5e
topology: v5e:2x2
jax: 0.10.0
libtpu: 0.0.40
codegen_flags: <defaults>
</compile_context>

<pallas_src>
import math

import jax
import jax.numpy as jnp
from jax.experimental import pallas as pl
from jax.experimental.pallas import tpu as pltpu

# ----------------------------- model dimensions ------------------------------
B = 2            # batch
S = 8            # sequence length
E = 32           # embedding_dim
D = 16           # dim_out (per head, and FFN hidden)
H = 4            # attention_heads
N = B * S        # rows after folding the batch into one fused step (16)
HD = H * D       # concat-head feature dim (64)
HN = H * N       # rows after stacking heads along sublanes (64)
NUM_BLOCKS = 1
LN_EPS = 1e-5
MASKED_FILL = -1.0e9   # exact torch masked_fill value for own-block masked keys
CROSS_FILL = -2.0e9    # cross-head / cross-batch blocks (strictly below MASKED_FILL)


def _layernorm(x, gamma, beta):
    mu = jnp.mean(x, axis=-1, keepdims=True)
    var = jnp.mean((x - mu) ** 2, axis=-1, keepdims=True)
    return (x - mu) * jax.lax.rsqrt(var + LN_EPS) * gamma + beta


def _gelu_exact(x):
    # torch.nn.GELU() default = exact erf formulation (kept exact for parity)
    return 0.5 * x * (1.0 + jax.lax.erf(x * (1.0 / math.sqrt(2.0))))


# --------------------------------- kernel ------------------------------------
def mlattention_kernel(x_ref, fill_ref, qkv_slab_ref, wv_ref, o_ref):
    x = x_ref[...]                                   # (N, E)
    fill = fill_ref[...]                             # (HN, HN) replacement mask
    wqkv = qkv_slab_ref[...]                         # (E+8, 3*HD): rows 0..E-1 weights,
                                                     # row E = biases, rows E+1.. zero
    # Merged Wo/W1/W2 + vector slab, aligned static slices (offsets 0/64/96/128).
    wo = wv_ref[0:HD, :]                             # (64, 32)
    w1p = wv_ref[HD:HD + E, :]                       # (32, 32) cols >= D are zero
    w2p = wv_ref[HD + E:HD + 2 * E, :]               # (32, 32) rows >= D are zero
    vecs = wv_ref[HD + 2 * E:HD + 2 * E + 8, :]      # (8, 32) packed vector rows
    bo, g1, beta1 = vecs[0:1, :], vecs[1:2, :], vecs[2:3, :]
    bff1p, bff2 = vecs[3:4, :], vecs[4:5, :]
    g2, beta2 = vecs[5:6, :], vecs[6:7, :]

    # Augment x with ones columns so the single fused matmul also applies the
    # Q/K/V biases (slab rows E+1..E+7 are zero, so the extra lanes are inert).
    x_aug = jnp.concatenate([x, jnp.ones((N, 8), jnp.float32)], axis=-1)      # (N, E+8)

    # One lane-filled MXU matmul -> Q,K,V for all heads; Wq/bq pre-scaled by
    # 1/sqrt(S) (the module's `query.size(1)` quirk), so no divide in-kernel.
    qkv = jnp.dot(x_aug, wqkv, preferred_element_type=jnp.float32)            # (N, 3*HD)

    # Stack heads along sublanes: lane blocks (N, D) per head -> (H*N, D).
    def stack_heads(off):
        return jnp.concatenate(
            [qkv[:, off + h * D: off + (h + 1) * D] for h in range(H)], axis=0)

    q_s = stack_heads(0)                                                       # (HN, D)
    k_s = stack_heads(HD)                                                      # (HN, D)
    v_s = stack_heads(2 * HD)                                                  # (HN, D)

    # ONE score matmul covering all heads and batch elements.
    s = jax.lax.dot_general(q_s, k_s, (((1,), (1,)), ((), ())),
                            preferred_element_type=jnp.float32)                # (HN, HN)

    # Exact masked_fill semantics: valid key -> score, own-block masked key -> -1e9,
    # cross-head / cross-batch key -> -2e9 (never receives mass, even if every key
    # of a batch element is masked -> uniform over its own S keys, as in PyTorch).
    s = jnp.where(fill < -0.5, fill, s)

    # ONE wide softmax; exact division for parity with the PyTorch module.
    s = s - jnp.max(s, axis=-1, keepdims=True)
    p = jnp.exp(s)
    p = p / jnp.sum(p, axis=-1, keepdims=True)

    ctx_s = jnp.dot(p, v_s, preferred_element_type=jnp.float32)                # (HN, D)
    # Restitch heads back to lanes (sublane blocks are 16-row, i.e. 8-aligned).
    ctx = jnp.concatenate([ctx_s[h * N:(h + 1) * N, :] for h in range(H)],
                          axis=-1)                                             # (N, HD)

    # MultiHeadAttention output projection + LayerNorm.
    a = _layernorm(jnp.dot(ctx, wo, preferred_element_type=jnp.float32) + bo, g1, beta1)

    # feed_forward: Linear -> (Dropout=id) -> GELU -> Linear -> (Dropout=id).
    # Padded cols of w1p/bff1p give gelu(0)=0; padded rows of w2p are zero.
    h1 = _gelu_exact(jnp.dot(a, w1p, preferred_element_type=jnp.float32) + bff1p)
    h2 = jnp.dot(h1, w2p, preferred_element_type=jnp.float32) + bff2

    # Final LayerNorm.  Output stays (N, 32) lanes: a lane-dense (1, N*E) restitch
    # would need an in-kernel sublane->lane relayout costing more than the masked
    # store it saves at this size (review item marked low-priority polish).
    o_ref[...] = _layernorm(h2, g2, beta2)


# ----------------------- host-side one-time packing --------------------------
def pack_params(params):
    """Pack the 18 parameter tensors into 2 aligned slabs (run ONCE, hoisted)."""
    inv_scale = jnp.float32(1.0 / math.sqrt(S))   # query.size(1) quirk kept verbatim

    def heads_to_mat(w):  # (H, E, D) -> (E, H*D), head h at lanes [h*D:(h+1)*D]
        return jnp.transpose(w, (1, 0, 2)).reshape(E, HD)

    wqkv = jnp.concatenate(
        [heads_to_mat(params["wq"]) * inv_scale,
         heads_to_mat(params["wk"]),
         heads_to_mat(params["wv"])], axis=1)                              # (E, 3HD)
    bqkv = jnp.concatenate(
        [params["bq"].reshape(1, HD) * inv_scale,
         params["bk"].reshape(1, HD),
         params["bv"].reshape(1, HD)], axis=1)                             # (1, 3HD)
    qkv_slab = jnp.concatenate(
        [wqkv, bqkv, jnp.zeros((7, 3 * HD), jnp.float32)], axis=0)         # (40, 192)

    w1p = jnp.pad(params["w1"], ((0, 0), (0, E - D)))                      # (E, E)
    w2p = jnp.pad(params["w2"], ((0, E - D), (0, 0)))                      # (E, E)
    bff1p = jnp.pad(params["bff1"], ((0, 0), (0, E - D)))                  # (1, E)
    vec_rows = jnp.concatenate(
        [params["bo"], params["g1"], params["beta1"],
         bff1p, params["bff2"], params["g2"], params["beta2"],
         jnp.zeros((1, E), jnp.float32)], axis=0)                          # (8, E)
    wv_slab = jnp.concatenate([params["wo"], w1p, w2p, vec_rows], axis=0)  # (136, 32)
    return qkv_slab, wv_slab


def build_fill(mask):
    """Replacement-mask matrix for the fused (HN, HN) scores (run ONCE per mask)."""
    keep = (mask != 0).astype(jnp.float32)                       # (B, S)
    same_b = jnp.eye(B, dtype=jnp.float32)                       # (B, B)
    valid = jnp.broadcast_to(same_b[:, None, :, None] * keep[None, None, :, :],
                             (B, S, B, S))
    own_b = jnp.broadcast_to(same_b[:, None, :, None], (B, S, B, S))
    fill_nn = jnp.where(valid > 0, 0.0,
                        jnp.where(own_b > 0, MASKED_FILL, CROSS_FILL)).reshape(N, N)
    head_diag = jnp.eye(H, dtype=bool)[:, None, :, None]          # (H,1,H,1)
    fill = jnp.where(head_diag, fill_nn[None, :, None, :], CROSS_FILL)
    return fill.reshape(HN, HN).astype(jnp.float32)


# --------------------------------- forward -----------------------------------
def mlattention_forward(x, fill, qkv_slab, wv_slab):
    """x: (B, S, E) f32; fill / slabs come from build_fill / pack_params (hoisted)."""
    out = pl.pallas_call(
        mlattention_kernel,
        out_shape=jax.ShapeDtypeStruct((N, E), jnp.float32),
        grid_spec=pltpu.PrefetchScalarGridSpec(
            num_scalar_prefetch=0,
            grid=(1,),      # whole (tiny) problem in one step on every generation
            in_specs=[pl.BlockSpec((N, E), lambda i: (0, 0)),
                      pl.BlockSpec((HN, HN), lambda i: (0, 0)),
                      pl.BlockSpec((E + 8, 3 * HD), lambda i: (0, 0)),
                      pl.BlockSpec((HD + 2 * E + 8, E), lambda i: (0, 0))],
            out_specs=pl.BlockSpec((N, E), lambda i: (0, 0)),
        ),
        compiler_params=pltpu.CompilerParams(dimension_semantics=("arbitrary",)),
    )(x.reshape(N, E), fill, qkv_slab, wv_slab)
    # NOTE: MLAttention feeds the ORIGINAL input to every identical clone and returns
    # the last response, so a single block evaluation equals the module output.
    return out.reshape(B, S, E)


# ------------------------------ JAX reference ---------------------------------
def mlattention_reference(x, mask, params):
    """Pure-JAX per-head reference with identical math (sanity check only)."""
    with jax.default_matmul_precision("highest"):
        mask3 = mask.astype(jnp.float32)[:, None, :]
        scale = math.sqrt(S)
        ctxs = []
        for h in range(H):
            q = x @ params["wq"][h] + params["bq"][h]
            k = x @ params["wk"][h] + params["bk"][h]
            v = x @ params["wv"][h] + params["bv"][h]
            sc = jnp.einsum("bqd,bkd->bqk", q, k) / scale
            sc = jnp.where(mask3 == 0.0, MASKED_FILL, sc)
            p = jax.nn.softmax(sc, axis=-1)
            ctxs.append(jnp.einsum("bqk,bkd->bqd", p, v))
        ctx = jnp.concatenate(ctxs, axis=-1)
        a = ctx @ params["wo"] + params["bo"][0]
        a = _layernorm(a, params["g1"][0], params["beta1"][0])
        h1 = _gelu_exact(a @ params["w1"] + params["bff1"][0])
        h2 = h1 @ params["w2"] + params["bff2"][0]
        return _layernorm(h2, params["g2"][0], params["beta2"][0])


def init_params(key):
    ks = jax.random.split(key, 12)
    s = 0.05
    return {
        "wq": s * jax.random.normal(ks[0], (H, E, D), jnp.float32),
        "bq": s * jax.random.normal(ks[1], (H, D), jnp.float32),
        "wk": s * jax.random.normal(ks[2], (H, E, D), jnp.float32),
        "bk": s * jax.random.normal(ks[3], (H, D), jnp.float32),
        "wv": s * jax.random.normal(ks[4], (H, E, D), jnp.float32),
        "bv": s * jax.random.normal(ks[5], (H, D), jnp.float32),
        "wo": s * jax.random.normal(ks[6], (H * D, E), jnp.float32),
        "bo": s * jax.random.normal(ks[7], (1, E), jnp.float32),
        "g1": jnp.ones((1, E), jnp.float32),
        "beta1": jnp.zeros((1, E), jnp.float32),
        "w1": s * jax.random.normal(ks[8], (E, D), jnp.float32),
        "bff1": s * jax.random.normal(ks[9], (1, D), jnp.float32),
        "w2": s * jax.random.normal(ks[10], (D, E), jnp.float32),
        "bff2": s * jax.random.normal(ks[11], (1, E), jnp.float32),
        "g2": jnp.ones((1, E), jnp.float32),
        "beta2": jnp.zeros((1, E), jnp.float32),
    }


if __name__ == "__main__":
    key = jax.random.PRNGKey(0)
    k_x, k_p = jax.random.split(key, 2)

    x = jax.random.normal(k_x, (B, S, E), jnp.float32)
    # attention_mask: 1 = keep, 0 = masked (last two positions of batch 1 masked)
    mask = jnp.ones((B, S), jnp.float32).at[1, -2:].set(0.0)
    params = init_params(k_p)

    # One-time hoisted packing: slabs and fused mask are built once and reused
    # across calls; the jitted forward below contains only the Pallas call.
    qkv_slab, wv_slab = pack_params(params)
    fill = build_fill(mask)

    fwd = jax.jit(mlattention_forward)
    out = jax.block_until_ready(fwd(x, fill, qkv_slab, wv_slab))

    ref = mlattention_reference(x, mask, params)
    assert out.shape == (B, S, E)
    # Exact softmax division in-kernel -> tighter tolerance than before.
    assert jnp.allclose(out, ref, atol=1e-3, rtol=1e-3), "mismatch vs JAX reference"

    print("KERNEL_OK")
</pallas_src>

<mosaic_0001>
module attributes {stable_mosaic.version = 11 : i64} {
  func.func @mlattention_kernel(%arg0: i32, %arg1: memref<16x32xf32, #tpu.memory_space<vmem>>, %arg2: memref<64x64xf32, #tpu.memory_space<vmem>>, %arg3: memref<40x192xf32, #tpu.memory_space<vmem>>, %arg4: memref<136x32xf32, #tpu.memory_space<vmem>>, %arg5: memref<16x32xf32, #tpu.memory_space<vmem>>) attributes {dimension_semantics = [#tpu.dimension_semantics<arbitrary>], iteration_bounds = array<i64: 1>, scalar_prefetch = 0 : i64, scratch_operands = 0 : i64, tpu.core_type = #tpu.core_type<tc>, window_params = [{pipeline_mode = #tpu.pipeline_mode<synchronous>, transform_indices = @transform_0, window_bounds = array<i64: 16, 32>}, {pipeline_mode = #tpu.pipeline_mode<synchronous>, transform_indices = @transform_1, window_bounds = array<i64: 64, 64>}, {pipeline_mode = #tpu.pipeline_mode<synchronous>, transform_indices = @transform_2, window_bounds = array<i64: 40, 192>}, {pipeline_mode = #tpu.pipeline_mode<synchronous>, transform_indices = @transform_3, window_bounds = array<i64: 136, 32>}, {pipeline_mode = #tpu.pipeline_mode<synchronous>, transform_indices = @transform_4, window_bounds = array<i64: 16, 32>}]} {
    %c0 = arith.constant 0 : index
    %c0_0 = arith.constant 0 : index
    %0 = vector.load %arg1[%c0, %c0_0] : memref<16x32xf32, #tpu.memory_space<vmem>>, vector<16x32xf32>
    %c0_1 = arith.constant 0 : index
    %c0_2 = arith.constant 0 : index
    %1 = vector.load %arg2[%c0_1, %c0_2] : memref<64x64xf32, #tpu.memory_space<vmem>>, vector<64x64xf32>
    %c0_3 = arith.constant 0 : index
    %c0_4 = arith.constant 0 : index
    %2 = vector.load %arg3[%c0_3, %c0_4] : memref<40x192xf32, #tpu.memory_space<vmem>>, vector<40x192xf32>
    %c0_5 = arith.constant 0 : index
    %c0_6 = arith.constant 0 : index
    %3 = vector.load %arg4[%c0_5, %c0_6] : memref<136x32xf32, #tpu.memory_space<vmem>>, vector<64x32xf32>
    %c64 = arith.constant 64 : index
    %c0_7 = arith.constant 0 : index
    %4 = vector.load %arg4[%c64, %c0_7] : memref<136x32xf32, #tpu.memory_space<vmem>>, vector<32x32xf32>
    %c96 = arith.constant 96 : index
    %c0_8 = arith.constant 0 : index
    %5 = vector.load %arg4[%c96, %c0_8] : memref<136x32xf32, #tpu.memory_space<vmem>>, vector<32x32xf32>
    %c128 = arith.constant 128 : index
    %c0_9 = arith.constant 0 : index
    %6 = vector.load %arg4[%c128, %c0_9] : memref<136x32xf32, #tpu.memory_space<vmem>>, vector<8x32xf32>
    %7 = vector.extract_strided_slice %6 {offsets = [0, 0], sizes = [1, 32], strides = [1, 1]} : vector<8x32xf32> to vector<1x32xf32>
    %8 = vector.extract_strided_slice %6 {offsets = [1, 0], sizes = [1, 32], strides = [1, 1]} : vector<8x32xf32> to vector<1x32xf32>
    %9 = vector.extract_strided_slice %6 {offsets = [2, 0], sizes = [1, 32], strides = [1, 1]} : vector<8x32xf32> to vector<1x32xf32>
    %10 = vector.extract_strided_slice %6 {offsets = [3, 0], sizes = [1, 32], strides = [1, 1]} : vector<8x32xf32> to vector<1x32xf32>
    %11 = vector.extract_strided_slice %6 {offsets = [4, 0], sizes = [1, 32], strides = [1, 1]} : vector<8x32xf32> to vector<1x32xf32>
    %12 = vector.extract_strided_slice %6 {offsets = [5, 0], sizes = [1, 32], strides = [1, 1]} : vector<8x32xf32> to vector<1x32xf32>
    %13 = vector.extract_strided_slice %6 {offsets = [6, 0], sizes = [1, 32], strides = [1, 1]} : vector<8x32xf32> to vector<1x32xf32>
    %cst = arith.constant 1.000000e+00 : f32
    %14 = vector.broadcast %cst : f32 to vector<16x8xf32>
    %15 = tpu.concatenate %0, %14 in 1 : vector<16x32xf32>, vector<16x8xf32> -> vector<16x40xf32>
    %cst_10 = arith.constant dense<0.000000e+00> : vector<16x192xf32>
    %16 = tpu.matmul %15, %2, %cst_10 {dimension_numbers = #tpu.dot_dimension_numbers<[1], [0], [0], [1], [0, 0, 1, 1], [], []>} : vector<16x40xf32>, vector<40x192xf32>, vector<16x192xf32> -> vector<16x192xf32>
    %17 = vector.extract_strided_slice %16 {offsets = [0, 0], sizes = [16, 16], strides = [1, 1]} : vector<16x192xf32> to vector<16x16xf32>
    %18 = vector.extract_strided_slice %16 {offsets = [0, 16], sizes = [16, 16], strides = [1, 1]} : vector<16x192xf32> to vector<16x16xf32>
    %19 = vector.extract_strided_slice %16 {offsets = [0, 32], sizes = [16, 16], strides = [1, 1]} : vector<16x192xf32> to vector<16x16xf32>
    %20 = vector.extract_strided_slice %16 {offsets = [0, 48], sizes = [16, 16], strides = [1, 1]} : vector<16x192xf32> to vector<16x16xf32>
    %21 = tpu.concatenate %17, %18, %19, %20 in 0 : vector<16x16xf32>, vector<16x16xf32>, vector<16x16xf32>, vector<16x16xf32> -> vector<64x16xf32>
    %22 = vector.extract_strided_slice %16 {offsets = [0, 64], sizes = [16, 16], strides = [1, 1]} : vector<16x192xf32> to vector<16x16xf32>
    %23 = vector.extract_strided_slice %16 {offsets = [0, 80], sizes = [16, 16], strides = [1, 1]} : vector<16x192xf32> to vector<16x16xf32>
    %24 = vector.extract_strided_slice %16 {offsets = [0, 96], sizes = [16, 16], strides = [1, 1]} : vector<16x192xf32> to vector<16x16xf32>
    %25 = vector.extract_strided_slice %16 {offsets = [0, 112], sizes = [16, 16], strides = [1, 1]} : vector<16x192xf32> to vector<16x16xf32>
    %26 = tpu.concatenate %22, %23, %24, %25 in 0 : vector<16x16xf32>, vector<16x16xf32>, vector<16x16xf32>, vector<16x16xf32> -> vector<64x16xf32>
    %27 = vector.extract_strided_slice %16 {offsets = [0, 128], sizes = [16, 16], strides = [1, 1]} : vector<16x192xf32> to vector<16x16xf32>
    %28 = vector.extract_strided_slice %16 {offsets = [0, 144], sizes = [16, 16], strides = [1, 1]} : vector<16x192xf32> to vector<16x16xf32>
    %29 = vector.extract_strided_slice %16 {offsets = [0, 160], sizes = [16, 16], strides = [1, 1]} : vector<16x192xf32> to vector<16x16xf32>
    %30 = vector.extract_strided_slice %16 {offsets = [0, 176], sizes = [16, 16], strides = [1, 1]} : vector<16x192xf32> to vector<16x16xf32>
    %31 = tpu.concatenate %27, %28, %29, %30 in 0 : vector<16x16xf32>, vector<16x16xf32>, vector<16x16xf32>, vector<16x16xf32> -> vector<64x16xf32>
    %cst_11 = arith.constant dense<0.000000e+00> : vector<64x64xf32>
    %32 = tpu.matmul %21, %26, %cst_11 {dimension_numbers = #tpu.dot_dimension_numbers<[1], [1], [0], [0], [0, 0, 1, 0], [], []>} : vector<64x16xf32>, vector<64x16xf32>, vector<64x64xf32> -> vector<64x64xf32>
    %cst_12 = arith.constant -5.000000e-01 : f32
    %33 = vector.broadcast %cst_12 : f32 to vector<64x64xf32>
    %34 = arith.cmpf olt, %1, %33 : vector<64x64xf32>
    %35 = arith.select %34, %1, %32 : vector<64x64xi1>, vector<64x64xf32>
    %cst_13 = arith.constant dense<0xFF800000> : vector<64xf32>
    %36 = vector.multi_reduction <maximumf>, %35, %cst_13 [1] : vector<64x64xf32> to vector<64xf32>
    %37 = vector.shape_cast %36 : vector<64xf32> to vector<64x1xf32>
    %38 = vector.broadcast %37 : vector<64x1xf32> to vector<64x64xf32>
    %39 = arith.subf %35, %38 : vector<64x64xf32>
    %40 = math.exp %39 : vector<64x64xf32>
    %cst_14 = arith.constant dense<0.000000e+00> : vector<64xf32>
    %41 = vector.multi_reduction <add>, %40, %cst_14 [1] : vector<64x64xf32> to vector<64xf32>
    %42 = vector.shape_cast %41 : vector<64xf32> to vector<64x1xf32>
    %43 = vector.broadcast %42 : vector<64x1xf32> to vector<64x64xf32>
    %44 = arith.divf %40, %43 : vector<64x64xf32>
    %cst_15 = arith.constant dense<0.000000e+00> : vector<64x16xf32>
    %45 = tpu.matmul %44, %31, %cst_15 {dimension_numbers = #tpu.dot_dimension_numbers<[1], [0], [0], [1], [0, 0, 1, 1], [], []>} : vector<64x64xf32>, vector<64x16xf32>, vector<64x16xf32> -> vector<64x16xf32>
    %46 = vector.extract_strided_slice %45 {offsets = [0, 0], sizes = [16, 16], strides = [1, 1]} : vector<64x16xf32> to vector<16x16xf32>
    %47 = vector.extract_strided_slice %45 {offsets = [16, 0], sizes = [16, 16], strides = [1, 1]} : vector<64x16xf32> to vector<16x16xf32>
    %48 = vector.extract_strided_slice %45 {offsets = [32, 0], sizes = [16, 16], strides = [1, 1]} : vector<64x16xf32> to vector<16x16xf32>
    %49 = vector.extract_strided_slice %45 {offsets = [48, 0], sizes = [16, 16], strides = [1, 1]} : vector<64x16xf32> to vector<16x16xf32>
    %50 = tpu.concatenate %46, %47, %48, %49 in 1 : vector<16x16xf32>, vector<16x16xf32>, vector<16x16xf32>, vector<16x16xf32> -> vector<16x64xf32>
    %cst_16 = arith.constant dense<0.000000e+00> : vector<16x32xf32>
    %51 = tpu.matmul %50, %3, %cst_16 {dimension_numbers = #tpu.dot_dimension_numbers<[1], [0], [0], [1], [0, 0, 1, 1], [], []>} : vector<16x64xf32>, vector<64x32xf32>, vector<16x32xf32> -> vector<16x32xf32>
    %52 = vector.broadcast %7 : vector<1x32xf32> to vector<16x32xf32>
    %53 = arith.addf %51, %52 : vector<16x32xf32>
    %cst_17 = arith.constant dense<0.000000e+00> : vector<16xf32>
    %54 = vector.multi_reduction <add>, %53, %cst_17 [1] : vector<16x32xf32> to vector<16xf32>
    %55 = vector.shape_cast %54 : vector<16xf32> to vector<16x1xf32>
    %cst_18 = arith.constant 3.200000e+01 : f32
    %56 = vector.broadcast %cst_18 : f32 to vector<16x1xf32>
    %57 = arith.divf %55, %56 : vector<16x1xf32>
    %58 = vector.broadcast %57 : vector<16x1xf32> to vector<16x32xf32>
    %59 = arith.subf %53, %58 : vector<16x32xf32>
    %60 = arith.mulf %59, %59 : vector<16x32xf32>
    %cst_19 = arith.constant dense<0.000000e+00> : vector<16xf32>
    %61 = vector.multi_reduction <add>, %60, %cst_19 [1] : vector<16x32xf32> to vector<16xf32>
    %62 = vector.shape_cast %61 : vector<16xf32> to vector<16x1xf32>
    %cst_20 = arith.constant 3.200000e+01 : f32
    %63 = vector.broadcast %cst_20 : f32 to vector<16x1xf32>
    %64 = arith.divf %62, %63 : vector<16x1xf32>
    %65 = vector.broadcast %57 : vector<16x1xf32> to vector<16x32xf32>
    %66 = arith.subf %53, %65 : vector<16x32xf32>
    %cst_21 = arith.constant 9.99999974E-6 : f32
    %67 = vector.broadcast %cst_21 : f32 to vector<16x1xf32>
    %68 = arith.addf %64, %67 : vector<16x1xf32>
    %69 = math.rsqrt %68 : vector<16x1xf32>
    %70 = vector.broadcast %69 : vector<16x1xf32> to vector<16x32xf32>
    %71 = arith.mulf %66, %70 : vector<16x32xf32>
    %72 = vector.broadcast %8 : vector<1x32xf32> to vector<16x32xf32>
    %73 = arith.mulf %71, %72 : vector<16x32xf32>
    %74 = vector.broadcast %9 : vector<1x32xf32> to vector<16x32xf32>
    %75 = arith.addf %73, %74 : vector<16x32xf32>
    %cst_22 = arith.constant dense<0.000000e+00> : vector<16x32xf32>
    %76 = tpu.matmul %75, %4, %cst_22 {dimension_numbers = #tpu.dot_dimension_numbers<[1], [0], [0], [1], [0, 0, 1, 1], [], []>} : vector<16x32xf32>, vector<32x32xf32>, vector<16x32xf32> -> vector<16x32xf32>
    %77 = vector.broadcast %10 : vector<1x32xf32> to vector<16x32xf32>
    %78 = arith.addf %76, %77 : vector<16x32xf32>
    %cst_23 = arith.constant 5.000000e-01 : f32
    %79 = vector.broadcast %cst_23 : f32 to vector<16x32xf32>
    %80 = arith.mulf %79, %78 : vector<16x32xf32>
    %cst_24 = arith.constant 0.707106769 : f32
    %81 = vector.broadcast %cst_24 : f32 to vector<16x32xf32>
    %82 = arith.mulf %78, %81 : vector<16x32xf32>
    %83 = math.erf %82 : vector<16x32xf32>
    %cst_25 = arith.constant 1.000000e+00 : f32
    %84 = vector.broadcast %cst_25 : f32 to vector<16x32xf32>
    %85 = arith.addf %84, %83 : vector<16x32xf32>
    %86 = arith.mulf %80, %85 : vector<16x32xf32>
    %cst_26 = arith.constant dense<0.000000e+00> : vector<16x32xf32>
    %87 = tpu.matmul %86, %5, %cst_26 {dimension_numbers = #tpu.dot_dimension_numbers<[1], [0], [0], [1], [0, 0, 1, 1], [], []>} : vector<16x32xf32>, vector<32x32xf32>, vector<16x32xf32> -> vector<16x32xf32>
    %88 = vector.broadcast %11 : vector<1x32xf32> to vector<16x32xf32>
    %89 = arith.addf %87, %88 : vector<16x32xf32>
    %cst_27 = arith.constant dense<0.000000e+00> : vector<16xf32>
    %90 = vector.multi_reduction <add>, %89, %cst_27 [1] : vector<16x32xf32> to vector<16xf32>
    %91 = vector.shape_cast %90 : vector<16xf32> to vector<16x1xf32>
    %cst_28 = arith.constant 3.200000e+01 : f32
    %92 = vector.broadcast %cst_28 : f32 to vector<16x1xf32>
    %93 = arith.divf %91, %92 : vector<16x1xf32>
    %94 = vector.broadcast %93 : vector<16x1xf32> to vector<16x32xf32>
    %95 = arith.subf %89, %94 : vector<16x32xf32>
    %96 = arith.mulf %95, %95 : vector<16x32xf32>
    %cst_29 = arith.constant dense<0.000000e+00> : vector<16xf32>
    %97 = vector.multi_reduction <add>, %96, %cst_29 [1] : vector<16x32xf32> to vector<16xf32>
    %98 = vector.shape_cast %97 : vector<16xf32> to vector<16x1xf32>
    %cst_30 = arith.constant 3.200000e+01 : f32
    %99 = vector.broadcast %cst_30 : f32 to vector<16x1xf32>
    %100 = arith.divf %98, %99 : vector<16x1xf32>
    %101 = vector.broadcast %93 : vector<16x1xf32> to vector<16x32xf32>
    %102 = arith.subf %89, %101 : vector<16x32xf32>
    %cst_31 = arith.constant 9.99999974E-6 : f32
    %103 = vector.broadcast %cst_31 : f32 to vector<16x1xf32>
    %104 = arith.addf %100, %103 : vector<16x1xf32>
    %105 = math.rsqrt %104 : vector<16x1xf32>
    %106 = vector.broadcast %105 : vector<16x1xf32> to vector<16x32xf32>
    %107 = arith.mulf %102, %106 : vector<16x32xf32>
    %108 = vector.broadcast %12 : vector<1x32xf32> to vector<16x32xf32>
    %109 = arith.mulf %107, %108 : vector<16x32xf32>
    %110 = vector.broadcast %13 : vector<1x32xf32> to vector<16x32xf32>
    %111 = arith.addf %109, %110 : vector<16x32xf32>
    %c0_32 = arith.constant 0 : index
    %c0_33 = arith.constant 0 : index
    %112 = vector.load %arg5[%c0_32, %c0_33] : memref<16x32xf32, #tpu.memory_space<vmem>>, vector<16x32xf32>
    tpu.vector_store %arg5[%c0_32, %c0_33], %111 {strides = array<i32>} : memref<16x32xf32, #tpu.memory_space<vmem>>, vector<16x32xf32>,
    return
  }
  func.func @transform_0(%arg0: i32) -> (i32, i32) {
    %c0_i32 = arith.constant 0 : i32
    %c0_i32_0 = arith.constant 0 : i32
    %c0_i32_1 = arith.constant 0 : i32
    return %c0_i32, %c0_i32_0 : i32, i32
  }
  func.func @transform_1(%arg0: i32) -> (i32, i32) {
    %c0_i32 = arith.constant 0 : i32
    %c0_i32_0 = arith.constant 0 : i32
    %c0_i32_1 = arith.constant 0 : i32
    return %c0_i32, %c0_i32_0 : i32, i32
  }
  func.func @transform_2(%arg0: i32) -> (i32, i32) {
    %c0_i32 = arith.constant 0 : i32
    %c0_i32_0 = arith.constant 0 : i32
    %c0_i32_1 = arith.constant 0 : i32
    return %c0_i32, %c0_i32_0 : i32, i32
  }
  func.func @transform_3(%arg0: i32) -> (i32, i32) {
    %c0_i32 = arith.constant 0 : i32
    %c0_i32_0 = arith.constant 0 : i32
    %c0_i32_1 = arith.constant 0 : i32
    return %c0_i32, %c0_i32_0 : i32, i32
  }
  func.func @transform_4(%arg0: i32) -> (i32, i32) {
    %c0_i32 = arith.constant 0 : i32
    %c0_i32_0 = arith.constant 0 : i32
    %c0_i32_1 = arith.constant 0 : i32
    return %c0_i32, %c0_i32_0 : i32, i32
  }
}

</mosaic_0001>

<bundles_post_ra>
// kernel: mlattention_forward.1
= control target key start
LH: loop header
LB: loop body
LE: loop exit
PB: predicated region body
PF: predicated region fallthrough
CT: control target
= control target key end

     0   :  { %s1322_s0 = inlined_call_operand.vmem [shape: f32[16,32], index: 0, kind: input, shape index: {}]   ;;  %s1323_s1 = inlined_call_operand.vmem [shape: f32[64,64], index: 1, kind: input, shape index: {}]   ;;  %s1324_s2 = inlined_call_operand.vmem [shape: f32[40,192], index: 2, kind: input, shape index: {}]   ;;  %s1325_s3 = inlined_call_operand.vmem [shape: f32[136,32], index: 3, kind: input, shape index: {}]   ;;  %s1326_s4 = inlined_call_operand.hbm [shape: f32[16,32], index: 4, kind: output, shape index: {}]  }
   0x1   :  { %v36_v0 = vld [vmem:[%s1324_s2 + $0x40] sm:$0xff]  ;;  %v34_v1 = vld [vmem:[%s1324_s2 + $0x30] sm:$0xff] }
   0x2   :  { %76 = vmatpush.msra.mxu0 %v36_v0  ;;  %v32_v2 = vld [vmem:[%s1324_s2 + $0x20] sm:$0xff] }
   0x3   :  { %9 = vsyncpa [#allocation3], 0  ;;  %v30_v3 = vld [vmem:[%s1324_s2 + $0x10] sm:$0xff]  ;;  %v18_v4 = vld [vmem:[%s1322_s0] sm:$0xff]  ;;  %vm55_vm0 = vcmask 261120   ;;  %vm58_vm1 = vcmask 326656  }
   0x4   :  { %77 = vmatpush.msra.mxu0 %v34_v1  ;;  %v28_v5 = vld [vmem:[%s1324_s2] sm:$0xff]  ;;  %v56_v6 = vsel %vm55_vm0, %v18_v4, 1.0  ;;  %v19_v7 = vld [vmem:[%s1322_s0 + $0x8] sm:$0xff]  ;;  %s987_s29 = smov 112   ;;  %s988_s30 = smov 96   ;;  %v35_v18 = vld [vmem:[%s1324_s2 + $0x38] sm:$0xff] }
   0x5   :  { %v57_v8 = vsel %vm55_vm0, %v19_v7, 1.0  ;;  %s989_s5 = smov 80   ;;  %s990_s0 = smov 64   ;;  %v37_v17 = vld [vmem:[%s1324_s2 + $0x48] sm:$0xff]  ;;  %v31_v20 = vld [vmem:[%s1324_s2 + $0x18] sm:$0xff]  ;;  %vm161_vm2 = vcmask 130048  }
   0x6   :  { %78 = vmatpush.msra.mxu0 %v32_v2  ;;  %99 = vmatpush.msra.mxu1 %v37_v17  ;;  %v33_v19 = vld [vmem:[%s1324_s2 + $0x28] sm:$0xff]  ;;  %v20_v32 = vld [vmem:[%s1323_s1] sm:$0xff]  ;;  %vm251_vm4 = vcmask 523264   ;;  %v22_v35 = vld [vmem:[%s1323_s1 + $0x10] sm:$0xff]  ;;  %s833_s14 = sshll.u32 %s1326_s4, 4  ;;  %s996_s15 = smov 128   ;;  %s834_s14 = int_to_ptr.hbm [resolvable:$true] %s833_s14 }
   0x7   :  { %v29_v21 = vld [vmem:[%s1324_s2 + $0x8] sm:$0xff]  ;;  %vm235_vm3 = vcmp.lt.f32.partialorder %v20_v32, -0.5  ;;  %vm237_vm5 = vcmp.lt.f32.partialorder %v22_v35, -0.5  ;;  %v23_v43 = vld [vmem:[%s1323_s1 + $0x18] sm:$0xff]  ;;  %v24_v48 = vld [vmem:[%s1323_s1 + $0x20] sm:$0xff]  ;;  %s997_s2 = smov 8  }
   0x8   :  { %79 = vmatpush.msra.mxu0 %v30_v3  ;;  %100 = vmatpush.msra.mxu1 %v35_v18  ;;  %v21_v37 = vld [vmem:[%s1323_s1 + $0x8] sm:$0xff]  ;;  %vm238_vm7 = vcmp.lt.f32.partialorder %v23_v43, -0.5  ;;  %vm239_vm8 = vcmp.lt.f32.partialorder %v24_v48, -0.5  ;;  %v26_v56 = vld [vmem:[%s1323_s1 + $0x30] sm:$0xff]  ;;  %v27_v60 = vld [vmem:[%s1323_s1 + $0x38] sm:$0xff] }
   0x9   :  { %vm236_vm6 = vcmp.lt.f32.partialorder %v21_v37, -0.5  ;;  %v25_v52 = vld [vmem:[%s1323_s1 + $0x28] sm:$0xff]  ;;  %vm241_vm10 = vcmp.lt.f32.partialorder %v26_v56, -0.5  ;;  %vm242_vm11 = vcmp.lt.f32.partialorder %v27_v60, -0.5  ;;  %s991_s1 = smov 16  }
   0xa   :  { %80 = vmatpush.msra.mxu0 %v28_v5  ;;  %101 = vmatpush.msra.mxu1 %v33_v19  ;;  %vm240_vm9 = vcmp.lt.f32.partialorder %v25_v52, -0.5 }
   0xb   :  { %845 = vmatmul.msk.f32.vlgmr.msra.gmra.mxu0 %vm58_vm1, %v56_v6 }
   0xc   :  { %102 = vmatpush.msra.mxu1 %v31_v20 }
   0xe   :  { %103 = vmatpush.msra.mxu1 %v29_v21 }
   0xf   :  { %847 = vmatmul.msk.f32.vlgmr.msra.gmra.mxu1 %vm58_vm1, %v56_v6 }
  0x13   :  { %846 = vmatmul.msk.f32.gmra.mxu0 %vm58_vm1, %v57_v8 }
  0x17   :  { %848 = vmatmul.msk.f32.gmra.mxu1 %vm58_vm1, %v57_v8 }
  0x88   :  { %v1048_v9 = vpop.f32.mrf.mxu0 }
  0x8c   :  { %v1109_v30 = vpop.f32.mrf.mxu1 }
  0x90   :  { %v1050_v10 = vpop.f32.mrf.mxu0 }
  0x91   :  { %115 = vrot.lane.b32.xlu2 %v1050_v10, %s987_s29  ;;  %119 = vrot.lane.b32.xlu1 %v1050_v10, %s988_s30 }
  0x92   :  { %123 = vrot.lane.b32.xlu0 %v1050_v10, %s989_s5 }
  0x94   :  { %v1111_v31 = vpop.f32.mrf.mxu1 }
  0x95   :  { %v900_v0 = vpack.i.bf16 %v1109_v30, %v1111_v31 }
  0x99   :  { %113 = vrot.lane.b32.xlu2 %v1048_v9, %s987_s29  ;;  %117 = vrot.lane.b32.xlu1 %v1048_v9, %s988_s30 }
  0x9a   :  { %121 = vrot.lane.b32.xlu0 %v1048_v9, %s989_s5 }
  0xeb   :  { %v116_v11 = vpop.permute.xlu2 %115 }
  0xf3   :  { %v114_v14 = vpop.permute.xlu2 %113 }
 0x103   :  { %v120_v12 = vpop.permute.xlu1 %119 }
 0x104   :  { %v124_v13 = vpop.permute.xlu0 %123  ;;  %155 = vrot.lane.b32.xlu2 %v120_v12, %s990_s0 }
 0x105   :  { %159 = vrot.lane.b32.xlu0 %v124_v13, %s990_s0 }
 0x10b   :  { %v118_v15 = vpop.permute.xlu1 %117 }
 0x10c   :  { %v122_v16 = vpop.permute.xlu0 %121  ;;  %149 = vrot.lane.b32.xlu2 %v114_v14, %s990_s0 }
 0x10d   :  { %153 = vrot.lane.b32.xlu0 %v118_v15, %s990_s0  ;;  %157 = vrot.lane.b32.xlu1 %v122_v16, %s990_s0 }
 0x115   :  { %147 = vrot.lane.b32.xlu0 %v1050_v10, %s990_s0  ;;  %151 = vrot.lane.b32.xlu1 %v116_v11, %s990_s0 }
 0x11d   :  { %145 = vrot.lane.b32.xlu1 %v1048_v9, %s990_s0 }
 0x15e   :  { %v156_v24 = vpop.permute.xlu2 %155 }
 0x166   :  { %v150_v27 = vpop.permute.xlu2 %149 }
 0x177   :  { %v160_v22 = vpop.permute.xlu0 %159 }
 0x178   :  { %849 = vmatpush.xpose.msk.msrb.mxu1 %vm161_vm2, %v160_v22  ;;  %881 = vmatpush.xpose.msk.msra.mxu2 %vm161_vm2, %v160_v22 }
 0x17f   :  { %v158_v23 = vpop.permute.xlu1 %157  ;;  %v154_v25 = vpop.permute.xlu0 %153 }
 0x180   :  { %850 = vmatpush.xpose.msk.msrb.mxu1 %vm161_vm2, %v158_v23  ;;  %882 = vmatpush.xpose.msk.msra.mxu2 %vm161_vm2, %v158_v23 }
 0x184   :  { %851 = vmatpush.xpose.msk.msrb.mxu1 %vm161_vm2, %v156_v24  ;;  %883 = vmatpush.xpose.msk.msra.mxu2 %vm161_vm2, %v156_v24 }
 0x187   :  { %v152_v26 = vpop.permute.xlu1 %151  ;;  %v148_v28 = vpop.permute.xlu0 %147 }
 0x188   :  { %852 = vmatpush.xpose.msk.msrb.mxu1 %vm161_vm2, %v154_v25  ;;  %884 = vmatpush.xpose.msk.msra.mxu2 %vm161_vm2, %v154_v25 }
 0x18c   :  { %853 = vmatpush.xpose.msk.msrb.mxu1 %vm161_vm2, %v152_v26  ;;  %885 = vmatpush.xpose.msk.msra.mxu2 %vm161_vm2, %v152_v26 }
 0x18f   :  { %v146_v29 = vpop.permute.xlu1 %145 }
 0x190   :  { %854 = vmatpush.xpose.msk.msrb.mxu1 %vm161_vm2, %v150_v27  ;;  %886 = vmatpush.xpose.msk.msra.mxu2 %vm161_vm2, %v150_v27 }
 0x194   :  { %855 = vmatpush.xpose.msk.msrb.mxu1 %vm161_vm2, %v148_v28  ;;  %887 = vmatpush.xpose.msk.msra.mxu2 %vm161_vm2, %v148_v28 }
 0x198   :  { %856 = vmatpush.xpose.msk.msrb.mxu1 %vm161_vm2, %v146_v29  ;;  %888 = vmatpush.xpose.msk.msra.mxu2 %vm161_vm2, %v146_v29 }
 0x19b   :  { %857 = vmatmul.msk.f32.vlgmr.msrb.gmra.mxu1 %vm161_vm2, %v1048_v9  ;;  %859 = vmatmul.msk.f32.vlgmr.msra.gmra.mxu2 %vm161_vm2, %v114_v14 }
 0x1a3   :  { %858 = vmatmul.msk.f32.gmra.mxu1 %vm161_vm2, %v1050_v10  ;;  %860 = vmatmul.msk.f32.gmra.mxu2 %vm161_vm2, %v116_v11 }
 0x1ab   :  { %861 = vmatmul.msk.f32.gmra.mxu2 %vm161_vm2, %v118_v15 }
 0x1b3   :  { %862 = vmatmul.msk.f32.gmra.mxu2 %vm161_vm2, %v120_v12 }
 0x1bb   :  { %863 = vmatmul.msk.f32.gmra.mxu2 %vm161_vm2, %v122_v16 }
 0x1c3   :  { %864 = vmatmul.msk.f32.gmra.mxu2 %vm161_vm2, %v124_v13 }
 0x218   :  { %v211_v33 = vpop.f32.mrf.mxu1 }
 0x219   :  { %v243_v34 = vsel %vm235_vm3, %v20_v32, %v211_v33 }
 0x21a   :  { %v252_v36 = vsel %vm251_vm4, %v243_v34, -inf }
 0x21b   :  { %253 = vmax.xlane.f32.xlu2 %v252_v36 }
 0x21e   :  { %v217_v38 = vpop.f32.mrf.mxu2 }
 0x21f   :  { %v245_v39 = vsel %vm237_vm5, %v22_v35, %v217_v38 }
 0x220   :  { %v214_v40 = vpop.f32.mrf.mxu1  ;;  %v258_v41 = vsel %vm251_vm4, %v245_v39, -inf }
 0x221   :  { %259 = vmax.xlane.f32.xlu1 %v258_v41  ;;  %v244_v42 = vsel %vm236_vm6, %v21_v37, %v214_v40 }
 0x222   :  { %v255_v44 = vsel %vm251_vm4, %v244_v42, -inf }
 0x223   :  { %256 = vmax.xlane.f32.xlu0 %v255_v44 }
 0x226   :  { %v220_v45 = vpop.f32.mrf.mxu2 }
 0x227   :  { %v246_v46 = vsel %vm238_vm7, %v23_v43, %v220_v45 }
 0x228   :  { %v261_v47 = vsel %vm251_vm4, %v246_v46, -inf }
 0x229   :  { %262 = vmax.xlane.f32.xlu2 %v261_v47 }
 0x22e   :  { %v223_v49 = vpop.f32.mrf.mxu2 }
 0x22f   :  { %v1132_v50 = vsel %vm239_vm8, %v24_v48, %v223_v49 }
 0x230   :  { %v264_v51 = vsel %vm251_vm4, %v1132_v50, -inf }
 0x231   :  { %265 = vmax.xlane.f32.xlu2 %v264_v51 }
 0x236   :  { %v226_v53 = vpop.f32.mrf.mxu2 }
 0x237   :  { %v248_v54 = vsel %vm240_vm9, %v25_v52, %v226_v53 }
 0x238   :  { %v267_v55 = vsel %vm251_vm4, %v248_v54, -inf }
 0x239   :  { %268 = vmax.xlane.f32.xlu0 %v267_v55 }
 0x23e   :  { %v229_v57 = vpop.f32.mrf.mxu2 }
 0x23f   :  { %v249_v58 = vsel %vm241_vm10, %v26_v56, %v229_v57 }
 0x240   :  { %v270_v59 = vsel %vm251_vm4, %v249_v58, -inf }
 0x241   :  { %271 = vmax.xlane.f32.xlu1 %v270_v59 }
 0x246   :  { %v232_v61 = vpop.f32.mrf.mxu2 }
 0x247   :  { %v250_v62 = vsel %vm242_vm11, %v27_v60, %v232_v61 }
 0x248   :  { %v273_v63 = vsel %vm251_vm4, %v250_v62, -inf }
 0x249   :  { %274 = vmax.xlane.f32.xlu0 %v273_v63 }
 0x25a   :  { %901 = vrot.lane.b32.xlu1 %v900_v0, %s989_s5 }
 0x25d   :  { %906 = vrot.lane.b32.xlu0 %v900_v0, %s988_s30  ;;  %s993_s30 = smov 48  }
 0x28e   :  { %v254_v1 = vpop.xlane.xlu2 %253 }
 0x28f   :  { %v276_v2 = vsub.f32 %v243_v34, %v254_v1 }
 0x291   :  { %v284_v3 = vmul.f32 1.442695, %v276_v2 }
 0x293   :  { %915 = vpow2.f32 %v284_v3 }
 0x294   :  { %v260_v4 = vpop.xlane.xlu1 %259 }
 0x295   :  { %v278_v5 = vsub.f32 %v245_v39, %v260_v4 }
 0x296   :  { %v257_v6 = vpop.xlane.xlu0 %256 }
 0x297   :  { %v288_v7 = vmul.f32 1.442695, %v278_v5  ;;  %v277_v8 = vsub.f32 %v244_v42, %v257_v6 }
 0x299   :  { %v1152_v9 = vpop.eup %915  ;;  %917 = vpow2.f32 %v288_v7  ;;  %v286_v10 = vmul.f32 1.442695, %v277_v8 }
 0x29a   :  { %v300_v11 = vsel %vm251_vm4, %v1152_v9, 0.0 }
 0x29b   :  { %919 = vpow2.f32 %v286_v10  ;;  %301 = vadd.xlane.f32.xlu2 %v300_v11 }
 0x29c   :  { %v263_v12 = vpop.xlane.xlu2 %262 }
 0x29d   :  { %v279_v13 = vsub.f32 %v246_v46, %v263_v12 }
 0x29f   :  { %v1156_v14 = vpop.eup %917  ;;  %v290_v15 = vmul.f32 1.442695, %v279_v13 }
 0x2a0   :  { %v306_v16 = vsel %vm251_vm4, %v1156_v14, 0.0 }
 0x2a1   :  { %v1160_v17 = vpop.eup %919  ;;  %921 = vpow2.f32 %v290_v15  ;;  %307 = vadd.xlane.f32.xlu1 %v306_v16 }
 0x2a2   :  { %v303_v18 = vsel %vm251_vm4, %v1160_v17, 0.0 }
 0x2a3   :  { %304 = vadd.xlane.f32.xlu2 %v303_v18 }
 0x2a4   :  { %v266_v40 = vpop.xlane.xlu2 %265 }
 0x2a5   :  { %v280_v44 = vsub.f32 %v1132_v50, %v266_v40 }
 0x2a7   :  { %v1164_v19 = vpop.eup %921  ;;  %v292_v46 = vmul.f32 1.442695, %v280_v44 }
 0x2a8   :  { %v309_v20 = vsel %vm251_vm4, %v1164_v19, 0.0 }
 0x2a9   :  { %310 = vadd.xlane.f32.xlu0 %v309_v20 }
 0x2ac   :  { %v269_v21 = vpop.xlane.xlu0 %268 }
 0x2ad   :  { %v281_v22 = vsub.f32 %v248_v54, %v269_v21 }
 0x2af   :  { %v294_v23 = vmul.f32 1.442695, %v281_v22 }
 0x2b1   :  { %923 = vpow2.f32 %v294_v23 }
 0x2b4   :  { %v272_v24 = vpop.xlane.xlu1 %271 }
 0x2b5   :  { %v282_v25 = vsub.f32 %v249_v58, %v272_v24 }
 0x2b7   :  { %v1168_v26 = vpop.eup %923  ;;  %v296_v27 = vmul.f32 1.442695, %v282_v25 }
 0x2b8   :  { %v315_v28 = vsel %vm251_vm4, %v1168_v26, 0.0 }
 0x2b9   :  { %925 = vpow2.f32 %v296_v27  ;;  %316 = vadd.xlane.f32.xlu1 %v315_v28 }
 0x2bb   :  { %911 = vrot.lane.b32.xlu2 %v900_v0, %s987_s29  ;;  %s992_s29 = smov 32  }
 0x2bc   :  { %v275_v29 = vpop.xlane.xlu0 %274 }
 0x2bd   :  { %v283_v32 = vsub.f32 %v250_v62, %v275_v29 }
 0x2bf   :  { %v1173_v33 = vpop.eup %925  ;;  %v298_v34 = vmul.f32 1.442695, %v283_v32 }
 0x2c0   :  { %v318_v35 = vsel %vm251_vm4, %v1173_v33, 0.0 }
 0x2c1   :  { %927 = vpow2.f32 %v298_v34  ;;  %319 = vadd.xlane.f32.xlu0 %v318_v35 }
 0x2c2   :  { %929 = vpow2.f32 %v292_v46 }
 0x2c7   :  { %v1177_v36 = vpop.eup %927 }
 0x2c8   :  { %v321_v37 = vsel %vm251_vm4, %v1177_v36, 0.0  ;;  %v1182_v47 = vpop.eup %929 }
 0x2c9   :  { %322 = vadd.xlane.f32.xlu1 %v321_v37  ;;  %v312_v48 = vsel %vm251_vm4, %v1182_v47, 0.0 }
 0x2cc   :  { %v902_v38 = vpop.permute.xlu1 %901 }
 0x2cd   :  { %v903_v39 = vunpack.i.l.bf16 %v902_v38  ;;  %v904_v42 = vunpack.i.h.bf16 %v902_v38 }
 0x2cf   :  { %476 = vmatpush.msra.mxu3 %v903_v39  ;;  %v907_v41 = vpop.permute.xlu0 %906 }
 0x2d0   :  { %v908_v43 = vunpack.i.l.bf16 %v907_v41  ;;  %v909_v45 = vunpack.i.h.bf16 %v907_v41 }
 0x2d1   :  { %477 = vmatpush.msra.mxu3 %v904_v42 }
 0x2d3   :  { %478 = vmatpush.msra.mxu3 %v908_v43 }
 0x2d5   :  { %479 = vmatpush.msra.mxu3 %v909_v45 }
 0x2e4   :  { %313 = vadd.xlane.f32.xlu2 %v312_v48 }
 0x30e   :  { %v302_v49 = vpop.xlane.xlu2 %301 }
 0x30f   :  { %931 = vrcp.f32 %v302_v49  ;;  %v335_v60 = vand.u32 2147483648, %v302_v49  ;;  %vm329_vm13 = vweird.f32 %v302_v49  ;;  %v333_v63 = vand.u32 2147483647, %v302_v49 }
 0x311   :  { %v336_v4 = vor.u32 1.1754944e-38, %v335_v60  ;;  %vm334_vm15 = vcmp.eq.f32.partialorder %v333_v63, 8.507059e+37 }
 0x314   :  { %v308_v51 = vpop.xlane.xlu1 %307 }
 0x315   :  { %v932_v52 = vpop.eup %931  ;;  %933 = vrcp.f32 %v308_v51  ;;  %vm359_vm8 = vweird.f32 %v308_v51  ;;  %v363_v25 = vand.u32 2147483647, %v308_v51 }
 0x316   :  { %v325_v53 = vmul.f32 %v932_v52, %v302_v49  ;;  %v305_v54 = vpop.xlane.xlu2 %304  ;;  %vm330_vm12 = vweird.f32 %v932_v52 }
 0x317   :  { %935 = vrcp.f32 %v305_v54  ;;  %vm331_vm14 = vmor %vm329_vm13, %vm330_vm12  ;;  %v350_v12 = vand.u32 2147483648, %v305_v54  ;;  %vm344_vm3 = vweird.f32 %v305_v54  ;;  %v348_v15 = vand.u32 2147483647, %v305_v54 }
 0x318   :  { %v326_v50 = vsub.f32 1.0, %v325_v53  ;;  %vm364_vm10 = vcmp.eq.f32.partialorder %v363_v25, 8.507059e+37 }
 0x319   :  { %v351_v21 = vor.u32 1.1754944e-38, %v350_v12  ;;  %vm349_vm6 = vcmp.eq.f32.partialorder %v348_v15, 8.507059e+37 }
 0x31a   :  { %v327_v55 = vmul.f32 %v932_v52, %v326_v50 }
 0x31b   :  { %v934_v56 = vpop.eup %933 }
 0x31c   :  { %v1186_v57 = vpop.xlane.xlu0 %310  ;;  %v328_v58 = vadd.f32 %v932_v52, %v327_v55  ;;  %v355_v1 = vmul.f32 %v934_v56, %v308_v51  ;;  %vm360_vm7 = vweird.f32 %v934_v56 }
 0x31d   :  { %v936_v59 = vpop.eup %935  ;;  %937 = vrcp.f32 %v1186_v57  ;;  %vm361_vm9 = vmor %vm359_vm8, %vm360_vm7  ;;  %v380_v34 = vand.u32 2147483648, %v1186_v57  ;;  %vm374_vm12 = vweird.f32 %v1186_v57  ;;  %v378_v37 = vand.u32 2147483647, %v1186_v57 }
 0x31e   :  { %v340_v61 = vmul.f32 %v936_v59, %v305_v54  ;;  %v912_v62 = vpop.permute.xlu2 %911  ;;  %v332_v3 = vsel %vm331_vm14, %v932_v52, %v328_v58  ;;  %v356_v8 = vsub.f32 1.0, %v355_v1  ;;  %vm345_vm1 = vweird.f32 %v936_v59 }
 0x31f   :  { %v913_v0 = vunpack.i.l.bf16 %v912_v62  ;;  %v914_v5 = vunpack.i.h.bf16 %v912_v62  ;;  %v337_v7 = vsel %vm334_vm15, %v336_v4, %v332_v3  ;;  %vm346_vm5 = vmor %vm344_vm3, %vm345_vm1  ;;  %v381_v38 = vor.u32 1.1754944e-38, %v380_v34  ;;  %v44_v34 = vld [vmem:[%s1325_s3 + $0x30] sm:$0xff] }
 0x320   :  { %v341_v2 = vsub.f32 1.0, %v340_v61  ;;  %v338_v13 = vmul.f32 %v1152_v9, %v337_v7  ;;  %v357_v16 = vmul.f32 %v934_v56, %v356_v8  ;;  %vm379_vm14 = vcmp.eq.f32.partialorder %v378_v37, 8.507059e+37  ;;  %v42_v37 = vld [vmem:[%s1325_s3 + $0x20] sm:$0xff] }
 0x321   :  { %480 = vmatpush.msra.mxu3 %v913_v0 }
 0x322   :  { %v342_v6 = vmul.f32 %v936_v59, %v341_v2  ;;  %v358_v24 = vadd.f32 %v934_v56, %v357_v16 }
 0x323   :  { %481 = vmatpush.msra.mxu3 %v914_v5  ;;  %v938_v11 = vpop.eup %937 }
 0x324   :  { %v343_v10 = vadd.f32 %v936_v59, %v342_v6  ;;  %v370_v18 = vmul.f32 %v938_v11, %v1186_v57  ;;  %v362_v27 = vsel %vm361_vm9, %v934_v56, %v358_v24  ;;  %vm375_vm11 = vweird.f32 %v938_v11 }
 0x325   :  { %482 = vmatpush.msra.mxu3 %v1111_v31  ;;  %v365_v31 = vand.u32 2147483648, %v308_v51  ;;  %vm376_vm13 = vmor %vm374_vm12, %vm375_vm11 }
 0x326   :  { %v347_v20 = vsel %vm346_vm5, %v936_v59, %v343_v10  ;;  %v371_v23 = vsub.f32 1.0, %v370_v18 }
 0x327   :  { %483 = vmatpush.msra.mxu3 %v1109_v30  ;;  %v352_v22 = vsel %vm349_vm6, %v351_v21, %v347_v20  ;;  %v366_v28 = vor.u32 1.1754944e-38, %v365_v31 }
 0x328   :  { %865 = vmatmul.msk.f32.vlgmr.msra.gmra.mxu3 %vm251_vm4, %v338_v13  ;;  %v353_v9 = vmul.f32 %v1160_v17, %v352_v22  ;;  %v372_v30 = vmul.f32 %v938_v11, %v371_v23 }
 0x329   :  { %v367_v29 = vsel %vm364_vm10, %v366_v28, %v362_v27 }
 0x32a   :  { %v373_v32 = vadd.f32 %v938_v11, %v372_v30  ;;  %v368_v35 = vmul.f32 %v1156_v14, %v367_v29 }
 0x32c   :  { %v377_v17 = vsel %vm376_vm13, %v938_v11, %v373_v32  ;;  %v317_v41 = vpop.xlane.xlu1 %316 }
 0x32d   :  { %v382_v39 = vsel %vm379_vm14, %v381_v38, %v377_v17  ;;  %939 = vrcp.f32 %v317_v41  ;;  %v410_v62 = vand.u32 2147483648, %v317_v41  ;;  %vm404_vm7 = vweird.f32 %v317_v41  ;;  %v41_v17 = vld [vmem:[%s1325_s3 + $0x18] sm:$0xff]  ;;  %v40_v38 = vld [vmem:[%s1325_s3 + $0x10] sm:$0xff] }
 0x32e   :  { %v383_v40 = vmul.f32 %v1164_v19, %v382_v39  ;;  %v408_v1 = vand.u32 2147483647, %v317_v41  ;;  %v39_v39 = vld [vmem:[%s1325_s3 + $0x8] sm:$0xff] }
 0x32f   :  { %v411_v5 = vor.u32 1.1754944e-38, %v410_v62 }
 0x330   :  { %866 = vmatmul.msk.f32.gmra.mxu3 %vm251_vm4, %v353_v9  ;;  %vm409_vm9 = vcmp.eq.f32.partialorder %v408_v1, 8.507059e+37 }
 0x333   :  { %v940_v42 = vpop.eup %939 }
 0x334   :  { %v320_v43 = vpop.xlane.xlu0 %319  ;;  %v400_v14 = vmul.f32 %v940_v42, %v317_v41  ;;  %vm405_vm5 = vweird.f32 %v940_v42 }
 0x335   :  { %vm406_vm8 = vmor %vm404_vm7, %vm405_vm5  ;;  %v425_v10 = vand.u32 2147483648, %v320_v43  ;;  %vm419_vm11 = vweird.f32 %v320_v43  ;;  %v423_v12 = vand.u32 2147483647, %v320_v43  ;;  %vm537_vm5 = vcmask 392192  }
 0x336   :  { %v401_v46 = vsub.f32 1.0, %v400_v14 }
 0x337   :  { %v426_v15 = vor.u32 1.1754944e-38, %v425_v10  ;;  %vm424_vm13 = vcmp.eq.f32.partialorder %v423_v12, 8.507059e+37 }
 0x338   :  { %867 = vmatmul.msk.f32.gmra.mxu3 %vm251_vm4, %v368_v35  ;;  %v402_v53 = vmul.f32 %v940_v42, %v401_v46  ;;  %v43_v35 = vld [vmem:[%s1325_s3 + $0x28] sm:$0xff] }
 0x33a   :  { %v403_v60 = vadd.f32 %v940_v42, %v402_v53 }
 0x33c   :  { %v323_v48 = vpop.xlane.xlu1 %322  ;;  %v407_v4 = vsel %vm406_vm8, %v940_v42, %v403_v60  ;;  %v994_v60 = vmov 32.0  }
 0x33d   :  { %v412_v6 = vsel %vm409_vm9, %v411_v5, %v407_v4  ;;  %v440_v20 = vand.u32 2147483648, %v323_v48  ;;  %v438_v22 = vand.u32 2147483647, %v323_v48 }
 0x33e   :  { %v413_v11 = vmul.f32 %v1168_v26, %v412_v6 }
 0x33f   :  { %v441_v23 = vor.u32 1.1754944e-38, %v440_v20 }
 0x340   :  { %868 = vmatmul.msk.f32.gmra.mxu3 %vm251_vm4, %v383_v40  ;;  %v38_v40 = vld [vmem:[%s1325_s3] sm:$0xff] }
 0x357   :  { %v314_v44 = vpop.xlane.xlu2 %313 }
 0x358   :  { %941 = vrcp.f32 %v314_v44  ;;  %v395_v54 = vand.u32 2147483648, %v314_v44  ;;  %v393_v55 = vand.u32 2147483647, %v314_v44  ;;  %vm389_vm1 = vweird.f32 %v314_v44 }
 0x359   :  { %943 = vrcp.f32 %v320_v43 }
 0x35a   :  { %945 = vrcp.f32 %v323_v48  ;;  %v396_v57 = vor.u32 1.1754944e-38, %v395_v54  ;;  %vm394_vm6 = vcmp.eq.f32.partialorder %v393_v55, 8.507059e+37  ;;  %v1244_v54 = vld [vmem:[%s1325_s3 + $0x80] sm:$0xff] }
 0x35b   :  { %947 = vrcp.f32 %v994_v60 }
 0x35e   :  { %v942_v45 = vpop.eup %941 }
 0x35f   :  { %v385_v49 = vmul.f32 %v942_v45, %v314_v44  ;;  %v944_v51 = vpop.eup %943  ;;  %vm390_vm15 = vweird.f32 %v942_v45 }
 0x360   :  { %v415_v19 = vmul.f32 %v944_v51, %v320_v43  ;;  %vm391_vm3 = vmor %vm389_vm1, %vm390_vm15  ;;  %v946_v61 = vpop.eup %945  ;;  %vm420_vm10 = vweird.f32 %v944_v51  ;;  %vm434_vm15 = vweird.f32 %v323_v48 }
 0x361   :  { %v386_v52 = vsub.f32 1.0, %v385_v49  ;;  %v430_v3 = vmul.f32 %v946_v61, %v323_v48  ;;  %vm421_vm12 = vmor %vm419_vm11, %vm420_vm10  ;;  %vm435_vm14 = vweird.f32 %v946_v61 }
 0x362   :  { %v416_v58 = vsub.f32 1.0, %v415_v19  ;;  %vm436_vm1 = vmor %vm434_vm15, %vm435_vm14  ;;  %v540_v19 = vperm.slane %v1244_v54, 0 }
 0x363   :  { %v387_v50 = vmul.f32 %v942_v45, %v386_v52  ;;  %v431_v7 = vsub.f32 1.0, %v430_v3 }
 0x364   :  { %v417_v2 = vmul.f32 %v944_v51, %v416_v58 }
 0x365   :  { %v388_v56 = vadd.f32 %v942_v45, %v387_v50 }
 0x366   :  { %v418_v8 = vadd.f32 %v944_v51, %v417_v2 }
 0x367   :  { %v392_v59 = vsel %vm391_vm3, %v942_v45, %v388_v56  ;;  %vm439_vm3 = vcmp.eq.f32.partialorder %v438_v22, 8.507059e+37 }
 0x368   :  { %v397_v63 = vsel %vm394_vm6, %v396_v57, %v392_v59  ;;  %v422_v13 = vsel %vm421_vm12, %v944_v51, %v418_v8 }
 0x369   :  { %v398_v0 = vmul.f32 %v1182_v47, %v397_v63  ;;  %v432_v47 = vmul.f32 %v946_v61, %v431_v7  ;;  %v427_v16 = vsel %vm424_vm13, %v426_v15, %v422_v13  ;;  %v49_v13 = vld [vmem:[%s1325_s3 + $0x58] sm:$0xff]  ;;  %v48_v15 = vld [vmem:[%s1325_s3 + $0x50] sm:$0xff] }
 0x36a   :  { %v428_v21 = vmul.f32 %v1173_v33, %v427_v16  ;;  %646 = vmatpush.msra.mxu1 %v49_v13  ;;  %v47_v16 = vld [vmem:[%s1325_s3 + $0x48] sm:$0xff] }
 0x36b   :  { %869 = vmatmul.msk.f32.gmra.mxu3 %vm251_vm4, %v398_v0  ;;  %v433_v18 = vadd.f32 %v946_v61, %v432_v47 }
 0x36c   :  { %647 = vmatpush.msra.mxu1 %v48_v15 }
 0x36d   :  { %v437_v26 = vsel %vm436_vm1, %v946_v61, %v433_v18  ;;  %v948_v61 = vpop.eup %947  ;;  %v46_v18 = vld [vmem:[%s1325_s3 + $0x40] sm:$0xff] }
 0x36e   :  { %v442_v24 = vsel %vm439_vm3, %v441_v23, %v437_v26  ;;  %v577_v62 = vmul.f32 32.0, %v948_v61  ;;  %648 = vmatpush.msra.mxu1 %v47_v16  ;;  %v50_v16 = vld [vmem:[%s1325_s3 + $0x60] sm:$0xff] }
 0x36f   :  { %v443_v31 = vmul.f32 %v1177_v36, %v442_v24  ;;  %v45_v36 = vld [vmem:[%s1325_s3 + $0x38] sm:$0xff] }
 0x370   :  { %555 = vmatpush.msrb.mxu0 %v45_v36  ;;  %v578_v63 = vsub.f32 1.0, %v577_v62  ;;  %649 = vmatpush.msra.mxu1 %v46_v18 }
 0x372   :  { %556 = vmatpush.msrb.mxu0 %v44_v34  ;;  %v579_v0 = vmul.f32 %v948_v61, %v578_v63 }
 0x373   :  { %870 = vmatmul.msk.f32.gmra.mxu3 %vm251_vm4, %v413_v11 }
 0x374   :  { %557 = vmatpush.msrb.mxu0 %v43_v35  ;;  %v580_v1 = vadd.f32 %v948_v61, %v579_v0 }
 0x376   :  { %558 = vmatpush.msrb.mxu0 %v42_v37  ;;  %v624_v37 = vperm.slane %v1244_v54, 2 }
 0x378   :  { %559 = vmatpush.msrb.mxu0 %v41_v17 }
 0x37a   :  { %560 = vmatpush.msrb.mxu0 %v40_v38 }
 0x37b   :  { %871 = vmatmul.msk.f32.gmra.mxu3 %vm251_vm4, %v428_v21 }
 0x37c   :  { %561 = vmatpush.msrb.mxu0 %v39_v39 }
 0x37e   :  { %562 = vmatpush.msrb.mxu0 %v38_v40 }
 0x383   :  { %872 = vmatmul.msk.f32.gmra.mxu3 %vm251_vm4, %v443_v31 }
 0x3ab   :  { %v485_v9 = vpop.f32.mrf.mxu3 }
 0x3b3   :  { %v488_v25 = vpop.f32.mrf.mxu3 }
 0x3bb   :  { %v491_v30 = vpop.f32.mrf.mxu3 }
 0x3bc   :  { %511 = vrot.lane.b32.xlu0 %v491_v30, %s991_s1 }
 0x3c3   :  { %v494_v27 = vpop.f32.mrf.mxu3 }
 0x3c4   :  { %513 = vrot.lane.b32.xlu0 %v494_v27, %s991_s1 }
 0x3ee   :  { %v497_v33 = vpop.f32.mrf.mxu3 }
 0x3ef   :  { %519 = vrot.lane.b32.xlu2 %v497_v33, %s992_s29 }
 0x3f6   :  { %v500_v28 = vpop.f32.mrf.mxu3 }
 0x3f7   :  { %521 = vrot.lane.b32.xlu2 %v500_v28, %s992_s29 }
 0x3fe   :  { %v503_v29 = vpop.f32.mrf.mxu3 }
 0x3ff   :  { %527 = vrot.lane.b32.xlu1 %v503_v29, %s993_s30 }
 0x406   :  { %v506_v32 = vpop.f32.mrf.mxu3 }
 0x407   :  { %529 = vrot.lane.b32.xlu0 %v506_v32, %s993_s30  ;;  %v621_v32 = vperm.slane %v1244_v54, 1 }
 0x42e   :  { %v512_v41 = vpop.permute.xlu0 %511 }
 0x42f   :  { %v533_v43 = vsel %vm161_vm2, %v485_v9, %v512_v41 }
 0x436   :  { %v514_v44 = vpop.permute.xlu0 %513 }
 0x437   :  { %v534_v49 = vsel %vm161_vm2, %v488_v25, %v514_v44  ;;  %vm581_vm2 = vweird.f32 %v948_v61 }
 0x438   :  { %v1249_v2 = vsel %vm581_vm2, %v948_v61, %v580_v1  ;;  %v53_v1 = vld [vmem:[%s1325_s3 + $0x78] sm:$0xff] }
 0x439   :  { %764 = vmatpush.msra.mxu0 %v53_v1 }
 0x449   :  { %v520_v42 = vpop.permute.xlu2 %519 }
 0x44a   :  { %v535_v14 = vsel %vm55_vm0, %v533_v43, %v520_v42 }
 0x451   :  { %v522_v48 = vpop.permute.xlu2 %521 }
 0x452   :  { %v536_v51 = vsel %vm55_vm0, %v534_v49, %v522_v48 }
 0x471   :  { %v528_v45 = vpop.permute.xlu1 %527 }
 0x472   :  { %v538_v46 = vsel %vm537_vm5, %v535_v14, %v528_v45  ;;  %v627_v45 = vperm.slane %v1244_v54, 3 }
 0x473   :  { %873 = vmatmul.msk.f32.vlgmr.msrb.gmra.mxu0 %vm251_vm4, %v538_v46 }
 0x479   :  { %v530_v52 = vpop.permute.xlu0 %529 }
 0x47a   :  { %v539_v53 = vsel %vm537_vm5, %v536_v51, %v530_v52 }
 0x47b   :  { %874 = vmatmul.msk.f32.gmra.mxu0 %vm251_vm4, %v539_v53 }
 0x4f0   :  { %v564_v50 = vpop.f32.mrf.mxu0 }
 0x4f1   :  { %v565_v55 = vadd.f32 %v564_v50, %v540_v19 }
 0x4f3   :  { %v570_v56 = vsel %vm55_vm0, %v565_v55, 0.0 }
 0x4f4   :  { %571 = vadd.xlane.f32.xlu1 %v570_v56 }
 0x4f8   :  { %v567_v57 = vpop.f32.mrf.mxu0 }
 0x4f9   :  { %v568_v58 = vadd.f32 %v567_v57, %v540_v19 }
 0x4fb   :  { %v573_v59 = vsel %vm55_vm0, %v568_v58, 0.0 }
 0x4fc   :  { %574 = vadd.xlane.f32.xlu2 %v573_v59 }
 0x567   :  { %v572_v3 = vpop.xlane.xlu1 %571 }
 0x568   :  { %v583_v4 = vmul.f32 %v1249_v2, %v572_v3 }
 0x56a   :  { %v585_v5 = vsub.f32 %v565_v55, %v583_v4 }
 0x56c   :  { %v587_v6 = vmul.f32 %v585_v5, %v585_v5 }
 0x56e   :  { %v589_v7 = vsel %vm55_vm0, %v587_v6, 0.0  ;;  %v52_v6 = vld [vmem:[%s1325_s3 + $0x70] sm:$0xff] }
 0x56f   :  { %590 = vadd.xlane.f32.xlu0 %v589_v7  ;;  %v575_v8 = vpop.xlane.xlu2 %574  ;;  %765 = vmatpush.msra.mxu0 %v52_v6 }
 0x570   :  { %v584_v10 = vmul.f32 %v1249_v2, %v575_v8 }
 0x572   :  { %v586_v11 = vsub.f32 %v568_v58, %v584_v10 }
 0x574   :  { %v588_v12 = vmul.f32 %v586_v11, %v586_v11 }
 0x576   :  { %v592_v47 = vsel %vm55_vm0, %v588_v12, 0.0  ;;  %v51_v12 = vld [vmem:[%s1325_s3 + $0x68] sm:$0xff]  ;;  %s995_s3 = smov [#allocation2]  }
 0x577   :  { %593 = vadd.xlane.f32.xlu1 %v592_v47  ;;  %766 = vmatpush.msra.mxu0 %v51_v12  ;;  %s831_s11 = sshll.u32 %s995_s3, 4  ;;  %s832_s11 = int_to_ptr.vmem [resolvable:$true] %s831_s11 }
 0x579   :  { %767 = vmatpush.msra.mxu0 %v50_v16 }
 0x5e2   :  { %v591_v20 = vpop.xlane.xlu0 %590 }
 0x5e3   :  { %v595_v21 = vmul.f32 %v591_v20, %v1249_v2 }
 0x5e5   :  { %v597_v22 = vadd.f32 1e-05, %v595_v21 }
 0x5e7   :  { %949 = vrsqrt.f32 %v597_v22  ;;  %vm605_vm6 = vweird.f32 %v597_v22 }
 0x5ea   :  { %v594_v26 = vpop.xlane.xlu1 %593 }
 0x5eb   :  { %v596_v23 = vmul.f32 %v594_v26, %v1249_v2 }
 0x5ed   :  { %v950_v24 = vpop.eup %949  ;;  %v598_v31 = vadd.f32 1e-05, %v596_v23 }
 0x5ee   :  { %v600_v9 = vmul.f32 %v950_v24, %v597_v22  ;;  %vm606_vm4 = vweird.f32 %v950_v24 }
 0x5ef   :  { %951 = vrsqrt.f32 %v598_v31  ;;  %vm607_vm7 = vmor %vm605_vm6, %vm606_vm4  ;;  %vm615_vm9 = vweird.f32 %v598_v31 }
 0x5f0   :  { %v601_v25 = vmul.f32 %v950_v24, %v600_v9 }
 0x5f2   :  { %v602_v30 = vmul.f32 0.5, %v601_v25 }
 0x5f4   :  { %v603_v27 = vsub.f32 1.5, %v602_v30 }
 0x5f5   :  { %v952_v33 = vpop.eup %951 }
 0x5f6   :  { %v604_v28 = vmul.f32 %v950_v24, %v603_v27  ;;  %v610_v29 = vmul.f32 %v952_v33, %v598_v31  ;;  %vm616_vm8 = vweird.f32 %v952_v33 }
 0x5f7   :  { %vm617_vm10 = vmor %vm615_vm9, %vm616_vm8 }
 0x5f8   :  { %v608_v36 = vsel %vm607_vm7, %v950_v24, %v604_v28  ;;  %v611_v34 = vmul.f32 %v952_v33, %v610_v29 }
 0x5f9   :  { %v619_v35 = vmul.f32 %v608_v36, %v585_v5 }
 0x5fa   :  { %v612_v17 = vmul.f32 0.5, %v611_v34 }
 0x5fb   :  { %v622_v38 = vmul.f32 %v621_v32, %v619_v35 }
 0x5fc   :  { %v613_v39 = vsub.f32 1.5, %v612_v17 }
 0x5fd   :  { %v625_v40 = vadd.f32 %v624_v37, %v622_v38 }
 0x5fe   :  { %v614_v41 = vmul.f32 %v952_v33, %v613_v39 }
 0x5ff   :  { %875 = vmatmul.msk.f32.vlgmr.msra.gmra.mxu1 %vm55_vm0, %v625_v40 }
 0x600   :  { %v618_v42 = vsel %vm617_vm10, %v952_v33, %v614_v41 }
 0x601   :  { %v620_v43 = vmul.f32 %v618_v42, %v586_v11 }
 0x603   :  { %v623_v44 = vmul.f32 %v621_v32, %v620_v43 }
 0x605   :  { %v626_v14 = vadd.f32 %v624_v37, %v623_v44 }
 0x607   :  { %876 = vmatmul.msk.f32.gmra.mxu1 %vm55_vm0, %v626_v14 }
 0x67c   :  { %v651_v46 = vpop.f32.mrf.mxu1 }
 0x67d   :  { %v1274_v48 = vadd.f32 %v651_v46, %v627_v45 }
 0x67f   :  { %v1277_v49 = vmul.f32 0.70710677, %v1274_v48 }
 0x681   :  { %v661_v51 = vmul.f32 %v1277_v49, %v1277_v49 }
 0x683   :  { %v662_v52 = vmin.f32 %v661_v51, 16.0 }
 0x684   :  { %v654_v53 = vpop.f32.mrf.mxu1 }
 0x685   :  { %v663_v19 = vmul.f32 2.1237322e-06, %v662_v52  ;;  %v674_v50 = vmul.f32 3.8918573e-05, %v662_v52  ;;  %v1281_v55 = vadd.f32 %v654_v53, %v627_v45 }
 0x687   :  { %v664_v56 = vadd.f32 0.00028619796, %v663_v19  ;;  %v675_v57 = vadd.f32 0.001143296, %v674_v50  ;;  %v1284_v58 = vmul.f32 0.70710677, %v1281_v55 }
 0x689   :  { %v665_v59 = vmul.f32 %v664_v56, %v662_v52  ;;  %v676_v60 = vmul.f32 %v675_v57, %v662_v52  ;;  %v701_v61 = vmul.f32 %v1284_v58, %v1284_v58 }
 0x68b   :  { %v677_v62 = vadd.f32 0.014752088, %v676_v60  ;;  %v666_v63 = vadd.f32 0.0036580483, %v665_v59  ;;  %v702_v0 = vmin.f32 %v701_v61, 16.0 }
 0x68d   :  { %v678_v3 = vmul.f32 %v677_v62, %v662_v52  ;;  %v703_v4 = vmul.f32 2.1237322e-06, %v702_v0  ;;  %v714_v5 = vmul.f32 3.8918573e-05, %v702_v0  ;;  %v667_v8 = vmul.f32 %v666_v63, %v662_v52 }
 0x68e   :  { %v657_v62 = vmul.f32 0.5, %v1274_v48  ;;  %v745_v48 = vperm.slane %v1244_v54, 4 }
 0x68f   :  { %v679_v7 = vadd.f32 0.112945676, %v678_v3  ;;  %v704_v10 = vadd.f32 0.00028619796, %v703_v4  ;;  %v715_v11 = vadd.f32 0.001143296, %v714_v5 }
 0x690   :  { %v668_v20 = vadd.f32 0.05243302, %v667_v8  ;;  %v658_v8 = vmul.f32 0.5, %v1281_v55 }
 0x691   :  { %v680_v47 = vmul.f32 %v679_v7, %v662_v52  ;;  %v705_v13 = vmul.f32 %v704_v10, %v702_v0  ;;  %v716_v15 = vmul.f32 %v715_v11, %v702_v0 }
 0x692   :  { %v669_v31 = vmul.f32 %v668_v20, %v662_v52 }
 0x693   :  { %v681_v18 = vadd.f32 0.4994258, %v680_v47  ;;  %v717_v21 = vadd.f32 0.014752088, %v716_v15  ;;  %v706_v26 = vadd.f32 0.0036580483, %v705_v13 }
 0x694   :  { %v670_v27 = vadd.f32 0.18741608, %v669_v31 }
 0x695   :  { %v682_v22 = vmul.f32 %v681_v18, %v662_v52  ;;  %v718_v23 = vmul.f32 %v717_v21, %v702_v0  ;;  %v707_v25 = vmul.f32 %v706_v26, %v702_v0 }
 0x696   :  { %v671_v36 = vmul.f32 %v670_v27, %v662_v52 }
 0x697   :  { %v683_v24 = vadd.f32 1.0, %v682_v22  ;;  %v719_v9 = vadd.f32 0.112945676, %v718_v23  ;;  %v708_v28 = vadd.f32 0.05243302, %v707_v25 }
 0x698   :  { %v672_v39 = vadd.f32 1.1283791, %v671_v36 }
 0x699   :  { %953 = vrcp.f32 %v683_v24  ;;  %v720_v30 = vmul.f32 %v719_v9, %v702_v0  ;;  %v709_v37 = vmul.f32 %v708_v28, %v702_v0  ;;  %v695_v38 = vand.u32 2147483648, %v683_v24 }
 0x69a   :  { %v693_v41 = vand.u32 2147483647, %v683_v24  ;;  %vm689_vm12 = vweird.f32 %v683_v24  ;;  %v673_v45 = vmul.f32 %v672_v39, %v1277_v49  ;;  %v819_v39 = vperm.slane %v1244_v54, 5 }
 0x69b   :  { %v721_v33 = vadd.f32 0.4994258, %v720_v30  ;;  %v710_v42 = vadd.f32 0.18741608, %v709_v37  ;;  %v696_v44 = vor.u32 1.1754944e-38, %v695_v38 }
 0x69c   :  { %vm694_vm14 = vcmp.eq.f32.partialorder %v693_v41, 8.507059e+37 }
 0x69d   :  { %v722_v29 = vmul.f32 %v721_v33, %v702_v0  ;;  %v711_v52 = vmul.f32 %v710_v42, %v702_v0 }
 0x69f   :  { %v954_v32 = vpop.eup %953  ;;  %v723_v35 = vadd.f32 1.0, %v722_v29  ;;  %v712_v59 = vadd.f32 1.1283791, %v711_v52 }
 0x6a0   :  { %v685_v34 = vmul.f32 %v954_v32, %v683_v24  ;;  %vm690_vm11 = vweird.f32 %v954_v32 }
 0x6a1   :  { %955 = vrcp.f32 %v723_v35  ;;  %vm691_vm13 = vmor %vm689_vm12, %vm690_vm11  ;;  %v735_v57 = vand.u32 2147483648, %v723_v35  ;;  %v733_v61 = vand.u32 2147483647, %v723_v35  ;;  %vm729_vm1 = vweird.f32 %v723_v35 }
 0x6a2   :  { %v686_v17 = vsub.f32 1.0, %v685_v34  ;;  %v713_v4 = vmul.f32 %v712_v59, %v1284_v58 }
 0x6a3   :  { %v736_v49 = vor.u32 1.1754944e-38, %v735_v57  ;;  %vm734_vm5 = vcmp.eq.f32.partialorder %v733_v61, 8.507059e+37 }
 0x6a4   :  { %v687_v40 = vmul.f32 %v954_v32, %v686_v17 }
 0x6a6   :  { %v688_v43 = vadd.f32 %v954_v32, %v687_v40 }
 0x6a7   :  { %v956_v14 = vpop.eup %955 }
 0x6a8   :  { %v692_v46 = vsel %vm691_vm13, %v954_v32, %v688_v43  ;;  %v725_v53 = vmul.f32 %v956_v14, %v723_v35  ;;  %vm730_vm15 = vweird.f32 %v956_v14 }
 0x6a9   :  { %v697_v51 = vsel %vm694_vm14, %v696_v44, %v692_v46  ;;  %vm731_vm3 = vmor %vm729_vm1, %vm730_vm15 }
 0x6aa   :  { %v698_v19 = vmul.f32 %v697_v51, %v673_v45  ;;  %v726_v50 = vsub.f32 1.0, %v725_v53 }
 0x6ac   :  { %v877_v56 = vclamps-f32 %v698_v19, 1.0  ;;  %v727_v60 = vmul.f32 %v956_v14, %v726_v50 }
 0x6ae   :  { %v741_v63 = vadd.f32 1.0, %v877_v56  ;;  %v728_v1 = vadd.f32 %v956_v14, %v727_v60 }
 0x6b0   :  { %v743_v3 = vmul.f32 %v741_v63, %v657_v62  ;;  %v732_v0 = vsel %vm731_vm3, %v956_v14, %v728_v1 }
 0x6b1   :  { %v737_v5 = vsel %vm734_vm5, %v736_v49, %v732_v0 }
 0x6b2   :  { %879 = vmatmul.msk.f32.vlgmr.msra.gmra.mxu0 %vm55_vm0, %v743_v3  ;;  %v738_v6 = vmul.f32 %v737_v5, %v713_v4 }
 0x6b4   :  { %v878_v7 = vclamps-f32 %v738_v6, 1.0 }
 0x6b6   :  { %v742_v10 = vadd.f32 1.0, %v878_v7 }
 0x6b8   :  { %v744_v11 = vmul.f32 %v742_v10, %v658_v8 }
 0x6ba   :  { %880 = vmatmul.msk.f32.gmra.mxu0 %vm55_vm0, %v744_v11 }
 0x72f   :  { %v769_v12 = vpop.f32.mrf.mxu0 }
 0x730   :  { %v770_v47 = vadd.f32 %v769_v12, %v745_v48 }
 0x732   :  { %v775_v13 = vsel %vm55_vm0, %v770_v47, 0.0 }
 0x733   :  { %776 = vadd.xlane.f32.xlu2 %v775_v13 }
 0x737   :  { %v772_v58 = vpop.f32.mrf.mxu0 }
 0x738   :  { %v773_v15 = vadd.f32 %v772_v58, %v745_v48 }
 0x73a   :  { %v778_v16 = vsel %vm55_vm0, %v773_v15, 0.0 }
 0x73b   :  { %779 = vadd.xlane.f32.xlu0 %v778_v16 }
 0x7a6   :  { %v777_v18 = vpop.xlane.xlu2 %776 }
 0x7a7   :  { %v781_v20 = vmul.f32 %v777_v18, %v1249_v2 }
 0x7a9   :  { %v783_v55 = vsub.f32 %v770_v47, %v781_v20 }
 0x7ab   :  { %v785_v21 = vmul.f32 %v783_v55, %v783_v55 }
 0x7ad   :  { %v787_v22 = vsel %vm55_vm0, %v785_v21, 0.0 }
 0x7ae   :  { %788 = vadd.xlane.f32.xlu1 %v787_v22  ;;  %v780_v26 = vpop.xlane.xlu0 %779 }
 0x7af   :  { %v782_v23 = vmul.f32 %v780_v26, %v1249_v2 }
 0x7b1   :  { %v784_v24 = vsub.f32 %v773_v15, %v782_v23 }
 0x7b3   :  { %v786_v31 = vmul.f32 %v784_v24, %v784_v24 }
 0x7b5   :  { %v790_v9 = vsel %vm55_vm0, %v786_v31, 0.0 }
 0x7b6   :  { %791 = vadd.xlane.f32.xlu2 %v790_v9 }
 0x821   :  { %v789_v25 = vpop.xlane.xlu1 %788 }
 0x822   :  { %v793_v30 = vmul.f32 %v789_v25, %v1249_v2 }
 0x824   :  { %v795_v27 = vadd.f32 1e-05, %v793_v30 }
 0x826   :  { %957 = vrsqrt.f32 %v795_v27  ;;  %vm803_vm4 = vweird.f32 %v795_v27 }
 0x829   :  { %v792_v33 = vpop.xlane.xlu2 %791 }
 0x82a   :  { %v794_v28 = vmul.f32 %v792_v33, %v1249_v2  ;;  %v822_v2 = vperm.slane %v1244_v54, 6 }
 0x82c   :  { %v958_v29 = vpop.eup %957  ;;  %v796_v36 = vadd.f32 1e-05, %v794_v28 }
 0x82d   :  { %v798_v32 = vmul.f32 %v958_v29, %v795_v27  ;;  %vm804_vm2 = vweird.f32 %v958_v29 }
 0x82e   :  { %959 = vrsqrt.f32 %v796_v36  ;;  %vm805_vm6 = vmor %vm803_vm4, %vm804_vm2  ;;  %vm813_vm8 = vweird.f32 %v796_v36 }
 0x82f   :  { %v799_v34 = vmul.f32 %v958_v29, %v798_v32 }
 0x831   :  { %v800_v35 = vmul.f32 0.5, %v799_v34 }
 0x833   :  { %v801_v37 = vsub.f32 1.5, %v800_v35 }
 0x834   :  { %v960_v17 = vpop.eup %959 }
 0x835   :  { %v802_v38 = vmul.f32 %v958_v29, %v801_v37  ;;  %v808_v40 = vmul.f32 %v960_v17, %v796_v36  ;;  %vm814_vm7 = vweird.f32 %v960_v17 }
 0x836   :  { %vm815_vm9 = vmor %vm813_vm8, %vm814_vm7 }
 0x837   :  { %v806_v41 = vsel %vm805_vm6, %v958_v29, %v802_v38  ;;  %v809_v43 = vmul.f32 %v960_v17, %v808_v40 }
 0x838   :  { %v817_v42 = vmul.f32 %v806_v41, %v783_v55 }
 0x839   :  { %v810_v14 = vmul.f32 0.5, %v809_v43 }
 0x83a   :  { %v820_v44 = vmul.f32 %v819_v39, %v817_v42 }
 0x83b   :  { %v811_v45 = vsub.f32 1.5, %v810_v14 }
 0x83c   :  { %v823_v46 = vadd.f32 %v822_v2, %v820_v44 }
 0x83d   :  { %v812_v51 = vmul.f32 %v960_v17, %v811_v45 }
 0x83e   :  { %825 = vst.msk [vmem:[#allocation2] sm:$0xff] %vm55_vm0, %v823_v46 }
 0x83f   :  { %v816_v52 = vsel %vm815_vm9, %v960_v17, %v812_v51 }
 0x840   :  { %v818_v53 = vmul.f32 %v816_v52, %v784_v24 }
 0x842   :  { %v821_v19 = vmul.f32 %v819_v39, %v818_v53 }
 0x844   :  { %v824_v54 = vadd.f32 %v822_v2, %v821_v19 }
 0x846   :  { %826 = vst.msk [vmem:[#allocation2 + $0x8] sm:$0xff] %vm55_vm0, %v824_v54 }
 0x847   :  { %839 = dma.vmem_to_hbm [thread:$0]  %s832_s11, 256, %s834_s14, [#allocation3], %s996_s15, %s996_s15, %s997_s2  }
 0x848   :  { %985 = dma.done.wait [#allocation3], 256  }
 0x849   :  { %986 = vsyncadd [#allocation3], 4294967040 }
 0x84a   :  { %844 = vsyncpa [#allocation3], 1 }

</bundles_post_ra>
